<compile_context>
chip_gen: v7x
topology: tpu7x:2x2x1
jax: 0.10.0
libtpu: 0.0.40
codegen_flags: <defaults>
</compile_context>

<pallas_src>
import functools

import jax
import jax.numpy as jnp
from jax import lax
from jax.experimental import pallas as pl
from jax.experimental.pallas import tpu as pltpu

_NLL_CLAMP = 18.420680743952367  # -log(1e-8): clamp(prob, 1e-8) expressed in log space
_LANES = 128


def _crc_loss_kernel(x_ref, wct_ref, et_ref, params_ref, dt_ref, code_ref, out_ref):
    """One batch tile -> (1, 2, 128) lane-dense partials: [weighted NLL, weight]."""
    S = wct_ref.shape[0]

    # --- logits^T = W^T @ x^T : contract on the shared D axis (A @ B^T, MXU native).
    #     f32 in / f32 acc (bf16xbf16 dots are rejected by the interpret backend).
    logits = lax.dot_general(
        wct_ref[...], x_ref[...],
        dimension_numbers=(((1,), (1,)), ((), ())),
        preferred_element_type=jnp.float32)                     # (S, T)

    params = params_ref[...]                                    # (S, 3) f32
    w_t = params[:, 0:1]                                        # (S, 1)
    bias = params[:, 1:2]                                       # (S, 1)
    cr = params[:, 2:3]                                         # (S, 1) competing-risk mask

    dt = dt_ref[...]                                            # (1, T) f32
    code = code_ref[...]                                        # (1, T) int32 bitfield
    to_i = code & 0xFF                                          # (1, T)
    from_i = (code >> 8) & 0xFF                                 # (1, T)
    w_event = ((code >> 16) & 1).astype(jnp.float32)            # (1, T) valid*(1-cens)*(to<S)
    w_cens = ((code >> 17) & 1).astype(jnp.float32)             # (1, T) valid*cens

    # --- from-state embedding: e_contrib[s, t] = E[from_state[t], s]
    #     (S broadcast compare/selects against the resident E^T constant; out-of-range
    #      from_state stays 0, matching a zero one-hot row.)
    et = et_ref[...]                                            # (S, S), et[s, f] = E[f, s]
    e_contrib = jnp.zeros_like(logits)
    for f in range(S):
        e_contrib = jnp.where(from_i == f, et[:, f:f + 1], e_contrib)

    logits = logits + e_contrib + w_t * dt + bias               # time-interval term + bias

    # --- softmax over states (sublane axis), kept in log space
    m = jnp.max(logits, axis=0, keepdims=True)                  # (1, T)
    e = jnp.exp(logits - m)                                     # (S, T)
    denom = jnp.sum(e, axis=0, keepdims=True)                   # (1, T)
    log_denom = jnp.log(denom)

    # --- event branch: -log(max(probs[to], 1e-8)) == min(lse - logits[to], -log 1e-8)
    #     (to_state >= S would gather 0, but w_event is forced to 0 in that case)
    row = lax.broadcasted_iota(jnp.int32, logits.shape, 0)      # (S, T)
    logit_to = jnp.sum(jnp.where(row == to_i, logits, 0.0), axis=0, keepdims=True)
    nll_event = jnp.minimum((m + log_denom) - logit_to, _NLL_CLAMP)

    # --- censored branch: -log(max(1 - sum(probs[competing]), 1e-8))
    #     == log(denom) - log(max(denom - sum(e[competing]), 1e-8 * denom))
    cr_sum = jnp.sum(e * cr, axis=0, keepdims=True)
    nll_cens = log_denom - jnp.log(jnp.maximum(denom - cr_sum, 1e-8 * denom))

    per_loss = w_event * nll_event + w_cens * nll_cens          # (1, T)
    per_weight = w_event + w_cens                               # (1, T) valid-sample indicator
    rows = jnp.concatenate([per_loss, per_weight], axis=0)      # (2, T)

    # --- lane-dense partial reduction (2, T) -> (2, 128) via a log-depth tree
    t = rows.shape[1]
    parts = [rows[:, c * _LANES:(c + 1) * _LANES] for c in range(t // _LANES)]
    while len(parts) > 1:
        nxt = [parts[i] + parts[i + 1] for i in range(0, len(parts) - 1, 2)]
        if len(parts) % 2:
            nxt.append(parts[-1])
        parts = nxt
    out_ref[0] = parts[0]                                       # (1, 2, 128) output block


@functools.partial(jax.jit, static_argnames=("tile_b",))
def competing_risks_continuous_loss(x, W, E, w_t, b, time_start, time_end,
                                    from_state, to_state, is_censored,
                                    valid_mask, cr_mask, *, tile_b=8192):
    """Batched competing-risks continuous-time loss (Pallas TPU)."""
    B, D = x.shape
    S = W.shape[1]

    # ---- tile selection (static at trace time) -------------------------------
    b_round = pl.cdiv(B, _LANES) * _LANES
    t = pl.cdiv(min(int(tile_b), b_round), _LANES) * _LANES
    # keep >= 2 tiles when the batch allows so v7x's 2 TensorCores can split the grid
    if (b_round // t) < 2 and b_round >= 2 * _LANES:
        t = pl.cdiv(pl.cdiv(b_round, 2), _LANES) * _LANES
    num_tiles = pl.cdiv(B, t)
    b_pad = num_tiles * t
    pad = b_pad - B

    # ---- kernel operands ------------------------------------------------------
    # x stays in its natural (B, D) layout: only zero-padding, no concat/transpose/cast.
    x_p = jnp.pad(x.astype(jnp.float32), ((0, pad), (0, 0)))                    # (Bp, D)
    wct = W.T.astype(jnp.float32)                                               # (S, D)
    et = E.T.astype(jnp.float32)                                                # (S, S)
    params = jnp.stack([w_t, b, cr_mask], axis=1).astype(jnp.float32)           # (S, 3)

    # dt kept in f32 (bf16 dt would exceed tolerance via w_t * dt)
    dt = jnp.pad((time_end - time_start).astype(jnp.float32), (0, pad))[None, :]  # (1, Bp)

    # pack per-sample small ints + weights into one int32 bitfield row (8 B/sample total)
    cens = is_censored > 0
    valid = valid_mask > 0
    in_range = to_state < S
    w_event = valid & (~cens) & in_range
    w_cens = valid & cens
    code = ((to_state.astype(jnp.int32) & 0xFF)
            | ((from_state.astype(jnp.int32) & 0xFF) << 8)
            | (w_event.astype(jnp.int32) << 16)
            | (w_cens.astype(jnp.int32) << 17))
    code = jnp.pad(code, (0, pad))[None, :]          # padded samples -> zero weights
                                                     # (1, Bp) int32

    partials = pl.pallas_call(
        _crc_loss_kernel,
        out_shape=jax.ShapeDtypeStruct((num_tiles, 2, _LANES), jnp.float32),
        grid_spec=pltpu.PrefetchScalarGridSpec(
            num_scalar_prefetch=0,
            grid=(num_tiles,),
            in_specs=[
                pl.BlockSpec((t, D), lambda i: (i, 0)),        # x tile (natural layout)
                pl.BlockSpec((S, D), lambda i: (0, 0)),        # W^T (resident constant)
                pl.BlockSpec((S, S), lambda i: (0, 0)),        # E^T (resident constant)
                pl.BlockSpec((S, 3), lambda i: (0, 0)),        # [w_t, b, cr_mask]
                pl.BlockSpec((1, t), lambda i: (0, i)),        # dt stream (f32)
                pl.BlockSpec((1, t), lambda i: (0, i)),        # packed int32 bitfield stream
            ],
            out_specs=pl.BlockSpec((1, 2, _LANES), lambda i: (i, 0, 0)),
        ),
        compiler_params=pltpu.CompilerParams(
            # independent per-tile outputs -> tiles can be sharded across TensorCores
            dimension_semantics=("parallel",),
            # ample for double-buffered 32K tiles; within v7x's 64 MiB physical VMEM
            vmem_limit_bytes=32 * 1024 * 1024,
        ),
    )(x_p, wct, et, params, dt, code)

    loss_sum = jnp.sum(partials[:, 0, :])
    count = jnp.sum(partials[:, 1, :])               # valid-sample count (from the kernel)
    return loss_sum / jnp.maximum(1.0, count)


def _reference(x, W, E, w_t, b, time_start, time_end, from_state, to_state,
               is_censored, valid_mask, cr_mask):
    """Plain-JAX (f32) reference mirroring the PyTorch per-sample loop."""
    S = W.shape[1]
    from_onehot = jax.nn.one_hot(from_state, S, dtype=jnp.float32)
    dt = (time_end - time_start)[:, None]
    logits = x @ W + from_onehot @ E + dt * w_t[None, :] + b[None, :]
    probs = jax.nn.softmax(logits, axis=-1)
    to_c = jnp.clip(to_state, 0, S - 1)
    p_event = jnp.take_along_axis(probs, to_c[:, None], axis=1)[:, 0]
    cr_prob = jnp.sum(probs * cr_mask[None, :], axis=-1)
    surv = 1.0 - cr_prob
    nll_event = -jnp.log(jnp.maximum(p_event, 1e-8))
    nll_surv = -jnp.log(jnp.maximum(surv, 1e-8))
    cens = is_censored.astype(jnp.float32)
    valid = valid_mask.astype(jnp.float32)
    in_range = (to_state < S).astype(jnp.float32)
    per = valid * jnp.where(cens > 0.5, nll_surv, in_range * nll_event)
    cnt = jnp.sum(valid * jnp.where(cens > 0.5, 1.0, in_range))
    return jnp.sum(per) / jnp.maximum(1.0, cnt)


if __name__ == "__main__":
    B, D, S = 8, 32, 8                      # batch, features, number of states
    competing_risk_states = [1, 2]          # module __init__ argument
    # synthetic model.state_transitions: only from-states {0, 1} are modeled
    allowed_from_states = jnp.array([0, 1], dtype=jnp.int32)

    key = jax.random.PRNGKey(0)
    kx, kw, ke, kwt, kb, kfs, kts, kt0, kt1, kc = jax.random.split(key, 10)

    x = jax.random.normal(kx, (B, D), dtype=jnp.float32)
    # deterministic synthetic model parameters
    W = 0.1 * jax.random.normal(kw, (D, S), dtype=jnp.float32)
    E = 0.1 * jax.random.normal(ke, (S, S), dtype=jnp.float32)
    w_t = 0.05 * jax.random.normal(kwt, (S,), dtype=jnp.float32)
    b = 0.01 * jax.random.normal(kb, (S,), dtype=jnp.float32)

    from_state = jax.random.randint(kfs, (B,), 0, 4)     # some not in state_transitions
    to_state = jax.random.randint(kts, (B,), 0, S)
    time_start = jax.random.uniform(kt0, (B,), minval=0.0, maxval=1.0)
    time_end = time_start + jax.random.uniform(kt1, (B,), minval=0.1, maxval=2.0)
    is_censored = (jax.random.uniform(kc, (B,)) < 0.3).astype(jnp.int32)

    # TODO(synk): the dict-membership check `from_state in model.state_transitions`
    # is data/model metadata, precomputed here as a mask (no in-kernel equivalent).
    valid_mask = (from_state[:, None] == allowed_from_states[None, :]).any(axis=1)
    valid_mask = valid_mask.astype(jnp.float32)
    cr_mask = jnp.zeros((S,), jnp.float32).at[jnp.array(competing_risk_states)].set(1.0)

    loss = competing_risks_continuous_loss(
        x, W, E, w_t, b, time_start, time_end, from_state, to_state,
        is_censored, valid_mask, cr_mask, tile_b=8192)
    jax.block_until_ready(loss)

    ref = _reference(x, W, E, w_t, b, time_start, time_end, from_state,
                     to_state, is_censored, valid_mask, cr_mask)
    assert jnp.allclose(loss, ref, rtol=1e-4, atol=1e-4), (loss, ref)
    print("KERNEL_OK")
</pallas_src>

<mosaic_0001>
module attributes {stable_mosaic.version = 11 : i64} {
  func.func @_crc_loss_kernel(%arg0: i32, %arg1: memref<128x32xf32, #tpu.memory_space<vmem>>, %arg2: memref<8x32xf32, #tpu.memory_space<vmem>>, %arg3: memref<8x8xf32, #tpu.memory_space<vmem>>, %arg4: memref<8x3xf32, #tpu.memory_space<vmem>>, %arg5: memref<1x128xf32, #tpu.memory_space<vmem>>, %arg6: memref<1x128xi32, #tpu.memory_space<vmem>>, %arg7: memref<1x2x128xf32, #tpu.memory_space<vmem>>) attributes {dimension_semantics = [#tpu.dimension_semantics<parallel>], iteration_bounds = array<i64: 1>, scalar_prefetch = 0 : i64, scratch_operands = 0 : i64, tpu.core_type = #tpu.core_type<tc>, window_params = [{transform_indices = @transform_0, window_bounds = array<i64: 128, 32>}, {pipeline_mode = #tpu.pipeline_mode<synchronous>, transform_indices = @transform_1, window_bounds = array<i64: 8, 32>}, {pipeline_mode = #tpu.pipeline_mode<synchronous>, transform_indices = @transform_2, window_bounds = array<i64: 8, 8>}, {pipeline_mode = #tpu.pipeline_mode<synchronous>, transform_indices = @transform_3, window_bounds = array<i64: 8, 3>}, {transform_indices = @transform_4, window_bounds = array<i64: 1, 128>}, {transform_indices = @transform_5, window_bounds = array<i64: 1, 128>}, {transform_indices = @transform_6, window_bounds = array<i64: 1, 2, 128>}]} {
    %c0 = arith.constant 0 : index
    %c0_0 = arith.constant 0 : index
    %0 = vector.load %arg2[%c0, %c0_0] : memref<8x32xf32, #tpu.memory_space<vmem>>, vector<8x32xf32>
    %c0_1 = arith.constant 0 : index
    %c0_2 = arith.constant 0 : index
    %1 = vector.load %arg1[%c0_1, %c0_2] : memref<128x32xf32, #tpu.memory_space<vmem>>, vector<128x32xf32>
    %cst = arith.constant dense<0.000000e+00> : vector<8x128xf32>
    %2 = tpu.matmul %0, %1, %cst {dimension_numbers = #tpu.dot_dimension_numbers<[1], [1], [0], [0], [0, 0, 1, 0], [], []>} : vector<8x32xf32>, vector<128x32xf32>, vector<8x128xf32> -> vector<8x128xf32>
    %c0_3 = arith.constant 0 : index
    %c0_4 = arith.constant 0 : index
    %3 = vector.load %arg4[%c0_3, %c0_4] : memref<8x3xf32, #tpu.memory_space<vmem>>, vector<8x3xf32>
    %4 = vector.extract_strided_slice %3 {offsets = [0, 0], sizes = [8, 1], strides = [1, 1]} : vector<8x3xf32> to vector<8x1xf32>
    %5 = vector.extract_strided_slice %3 {offsets = [0, 1], sizes = [8, 1], strides = [1, 1]} : vector<8x3xf32> to vector<8x1xf32>
    %6 = vector.extract_strided_slice %3 {offsets = [0, 2], sizes = [8, 1], strides = [1, 1]} : vector<8x3xf32> to vector<8x1xf32>
    %c0_5 = arith.constant 0 : index
    %c0_6 = arith.constant 0 : index
    %7 = vector.load %arg5[%c0_5, %c0_6] : memref<1x128xf32, #tpu.memory_space<vmem>>, vector<1x128xf32>
    %c0_7 = arith.constant 0 : index
    %c0_8 = arith.constant 0 : index
    %8 = vector.load %arg6[%c0_7, %c0_8] : memref<1x128xi32, #tpu.memory_space<vmem>>, vector<1x128xi32>
    %c255_i32 = arith.constant 255 : i32
    %9 = vector.broadcast %c255_i32 : i32 to vector<1x128xi32>
    %10 = arith.andi %8, %9 : vector<1x128xi32>
    %c8_i32 = arith.constant 8 : i32
    %11 = vector.broadcast %c8_i32 : i32 to vector<1x128xi32>
    %12 = arith.shrsi %8, %11 : vector<1x128xi32>
    %c255_i32_9 = arith.constant 255 : i32
    %13 = vector.broadcast %c255_i32_9 : i32 to vector<1x128xi32>
    %14 = arith.andi %12, %13 : vector<1x128xi32>
    %c16_i32 = arith.constant 16 : i32
    %15 = vector.broadcast %c16_i32 : i32 to vector<1x128xi32>
    %16 = arith.shrsi %8, %15 : vector<1x128xi32>
    %c1_i32 = arith.constant 1 : i32
    %17 = vector.broadcast %c1_i32 : i32 to vector<1x128xi32>
    %18 = arith.andi %16, %17 : vector<1x128xi32>
    %19 = arith.sitofp %18 : vector<1x128xi32> to vector<1x128xf32>
    %c17_i32 = arith.constant 17 : i32
    %20 = vector.broadcast %c17_i32 : i32 to vector<1x128xi32>
    %21 = arith.shrsi %8, %20 : vector<1x128xi32>
    %c1_i32_10 = arith.constant 1 : i32
    %22 = vector.broadcast %c1_i32_10 : i32 to vector<1x128xi32>
    %23 = arith.andi %21, %22 : vector<1x128xi32>
    %24 = arith.sitofp %23 : vector<1x128xi32> to vector<1x128xf32>
    %c0_11 = arith.constant 0 : index
    %c0_12 = arith.constant 0 : index
    %25 = vector.load %arg3[%c0_11, %c0_12] : memref<8x8xf32, #tpu.memory_space<vmem>>, vector<8x8xf32>
    %cst_13 = arith.constant 0.000000e+00 : f32
    %26 = vector.broadcast %cst_13 : f32 to vector<8x128xf32>
    %c0_i32 = arith.constant 0 : i32
    %27 = vector.broadcast %c0_i32 : i32 to vector<1x128xi32>
    %28 = arith.cmpi eq, %14, %27 : vector<1x128xi32>
    %29 = vector.extract_strided_slice %25 {offsets = [0, 0], sizes = [8, 1], strides = [1, 1]} : vector<8x8xf32> to vector<8x1xf32>
    %30 = vector.shape_cast %28 : vector<1x128xi1> to vector<1x128xi1>
    %31 = vector.broadcast %30 : vector<1x128xi1> to vector<8x128xi1>
    %32 = vector.shape_cast %29 : vector<8x1xf32> to vector<8x1xf32>
    %33 = vector.broadcast %32 : vector<8x1xf32> to vector<8x128xf32>
    %34 = arith.select %31, %33, %26 : vector<8x128xi1>, vector<8x128xf32>
    %c1_i32_14 = arith.constant 1 : i32
    %35 = vector.broadcast %c1_i32_14 : i32 to vector<1x128xi32>
    %36 = arith.cmpi eq, %14, %35 : vector<1x128xi32>
    %37 = vector.extract_strided_slice %25 {offsets = [0, 1], sizes = [8, 1], strides = [1, 1]} : vector<8x8xf32> to vector<8x1xf32>
    %38 = vector.shape_cast %36 : vector<1x128xi1> to vector<1x128xi1>
    %39 = vector.broadcast %38 : vector<1x128xi1> to vector<8x128xi1>
    %40 = vector.shape_cast %37 : vector<8x1xf32> to vector<8x1xf32>
    %41 = vector.broadcast %40 : vector<8x1xf32> to vector<8x128xf32>
    %42 = arith.select %39, %41, %34 : vector<8x128xi1>, vector<8x128xf32>
    %c2_i32 = arith.constant 2 : i32
    %43 = vector.broadcast %c2_i32 : i32 to vector<1x128xi32>
    %44 = arith.cmpi eq, %14, %43 : vector<1x128xi32>
    %45 = vector.extract_strided_slice %25 {offsets = [0, 2], sizes = [8, 1], strides = [1, 1]} : vector<8x8xf32> to vector<8x1xf32>
    %46 = vector.shape_cast %44 : vector<1x128xi1> to vector<1x128xi1>
    %47 = vector.broadcast %46 : vector<1x128xi1> to vector<8x128xi1>
    %48 = vector.shape_cast %45 : vector<8x1xf32> to vector<8x1xf32>
    %49 = vector.broadcast %48 : vector<8x1xf32> to vector<8x128xf32>
    %50 = arith.select %47, %49, %42 : vector<8x128xi1>, vector<8x128xf32>
    %c3_i32 = arith.constant 3 : i32
    %51 = vector.broadcast %c3_i32 : i32 to vector<1x128xi32>
    %52 = arith.cmpi eq, %14, %51 : vector<1x128xi32>
    %53 = vector.extract_strided_slice %25 {offsets = [0, 3], sizes = [8, 1], strides = [1, 1]} : vector<8x8xf32> to vector<8x1xf32>
    %54 = vector.shape_cast %52 : vector<1x128xi1> to vector<1x128xi1>
    %55 = vector.broadcast %54 : vector<1x128xi1> to vector<8x128xi1>
    %56 = vector.shape_cast %53 : vector<8x1xf32> to vector<8x1xf32>
    %57 = vector.broadcast %56 : vector<8x1xf32> to vector<8x128xf32>
    %58 = arith.select %55, %57, %50 : vector<8x128xi1>, vector<8x128xf32>
    %c4_i32 = arith.constant 4 : i32
    %59 = vector.broadcast %c4_i32 : i32 to vector<1x128xi32>
    %60 = arith.cmpi eq, %14, %59 : vector<1x128xi32>
    %61 = vector.extract_strided_slice %25 {offsets = [0, 4], sizes = [8, 1], strides = [1, 1]} : vector<8x8xf32> to vector<8x1xf32>
    %62 = vector.shape_cast %60 : vector<1x128xi1> to vector<1x128xi1>
    %63 = vector.broadcast %62 : vector<1x128xi1> to vector<8x128xi1>
    %64 = vector.shape_cast %61 : vector<8x1xf32> to vector<8x1xf32>
    %65 = vector.broadcast %64 : vector<8x1xf32> to vector<8x128xf32>
    %66 = arith.select %63, %65, %58 : vector<8x128xi1>, vector<8x128xf32>
    %c5_i32 = arith.constant 5 : i32
    %67 = vector.broadcast %c5_i32 : i32 to vector<1x128xi32>
    %68 = arith.cmpi eq, %14, %67 : vector<1x128xi32>
    %69 = vector.extract_strided_slice %25 {offsets = [0, 5], sizes = [8, 1], strides = [1, 1]} : vector<8x8xf32> to vector<8x1xf32>
    %70 = vector.shape_cast %68 : vector<1x128xi1> to vector<1x128xi1>
    %71 = vector.broadcast %70 : vector<1x128xi1> to vector<8x128xi1>
    %72 = vector.shape_cast %69 : vector<8x1xf32> to vector<8x1xf32>
    %73 = vector.broadcast %72 : vector<8x1xf32> to vector<8x128xf32>
    %74 = arith.select %71, %73, %66 : vector<8x128xi1>, vector<8x128xf32>
    %c6_i32 = arith.constant 6 : i32
    %75 = vector.broadcast %c6_i32 : i32 to vector<1x128xi32>
    %76 = arith.cmpi eq, %14, %75 : vector<1x128xi32>
    %77 = vector.extract_strided_slice %25 {offsets = [0, 6], sizes = [8, 1], strides = [1, 1]} : vector<8x8xf32> to vector<8x1xf32>
    %78 = vector.shape_cast %76 : vector<1x128xi1> to vector<1x128xi1>
    %79 = vector.broadcast %78 : vector<1x128xi1> to vector<8x128xi1>
    %80 = vector.shape_cast %77 : vector<8x1xf32> to vector<8x1xf32>
    %81 = vector.broadcast %80 : vector<8x1xf32> to vector<8x128xf32>
    %82 = arith.select %79, %81, %74 : vector<8x128xi1>, vector<8x128xf32>
    %c7_i32 = arith.constant 7 : i32
    %83 = vector.broadcast %c7_i32 : i32 to vector<1x128xi32>
    %84 = arith.cmpi eq, %14, %83 : vector<1x128xi32>
    %85 = vector.extract_strided_slice %25 {offsets = [0, 7], sizes = [8, 1], strides = [1, 1]} : vector<8x8xf32> to vector<8x1xf32>
    %86 = vector.shape_cast %84 : vector<1x128xi1> to vector<1x128xi1>
    %87 = vector.broadcast %86 : vector<1x128xi1> to vector<8x128xi1>
    %88 = vector.shape_cast %85 : vector<8x1xf32> to vector<8x1xf32>
    %89 = vector.broadcast %88 : vector<8x1xf32> to vector<8x128xf32>
    %90 = arith.select %87, %89, %82 : vector<8x128xi1>, vector<8x128xf32>
    %91 = arith.addf %2, %90 : vector<8x128xf32>
    %92 = vector.broadcast %4 : vector<8x1xf32> to vector<8x128xf32>
    %93 = vector.broadcast %7 : vector<1x128xf32> to vector<8x128xf32>
    %94 = arith.mulf %92, %93 : vector<8x128xf32>
    %95 = arith.addf %91, %94 : vector<8x128xf32>
    %96 = vector.broadcast %5 : vector<8x1xf32> to vector<8x128xf32>
    %97 = arith.addf %95, %96 : vector<8x128xf32>
    %cst_15 = arith.constant dense<0xFF800000> : vector<128xf32>
    %98 = vector.multi_reduction <maximumf>, %97, %cst_15 [0] : vector<8x128xf32> to vector<128xf32>
    %99 = vector.shape_cast %98 : vector<128xf32> to vector<1x128xf32>
    %100 = vector.broadcast %99 : vector<1x128xf32> to vector<8x128xf32>
    %101 = arith.subf %97, %100 : vector<8x128xf32>
    %102 = math.exp %101 : vector<8x128xf32>
    %cst_16 = arith.constant dense<0.000000e+00> : vector<128xf32>
    %103 = vector.multi_reduction <add>, %102, %cst_16 [0] : vector<8x128xf32> to vector<128xf32>
    %104 = vector.shape_cast %103 : vector<128xf32> to vector<1x128xf32>
    %105 = math.log %104 : vector<1x128xf32>
    %106 = tpu.iota {dimensions = array<i32: 0>} : vector<8x128xi32>
    %107 = vector.broadcast %10 : vector<1x128xi32> to vector<8x128xi32>
    %108 = arith.cmpi eq, %106, %107 : vector<8x128xi32>
    %cst_17 = arith.constant 0.000000e+00 : f32
    %109 = vector.broadcast %cst_17 : f32 to vector<8x128xf32>
    %110 = arith.select %108, %97, %109 : vector<8x128xi1>, vector<8x128xf32>
    %cst_18 = arith.constant dense<0.000000e+00> : vector<128xf32>
    %111 = vector.multi_reduction <add>, %110, %cst_18 [0] : vector<8x128xf32> to vector<128xf32>
    %112 = vector.shape_cast %111 : vector<128xf32> to vector<1x128xf32>
    %113 = arith.addf %99, %105 : vector<1x128xf32>
    %114 = arith.subf %113, %112 : vector<1x128xf32>
    %cst_19 = arith.constant 18.420681 : f32
    %115 = vector.broadcast %cst_19 : f32 to vector<1x128xf32>
    %116 = arith.minimumf %114, %115 : vector<1x128xf32>
    %117 = vector.broadcast %6 : vector<8x1xf32> to vector<8x128xf32>
    %118 = arith.mulf %102, %117 : vector<8x128xf32>
    %cst_20 = arith.constant dense<0.000000e+00> : vector<128xf32>
    %119 = vector.multi_reduction <add>, %118, %cst_20 [0] : vector<8x128xf32> to vector<128xf32>
    %120 = vector.shape_cast %119 : vector<128xf32> to vector<1x128xf32>
    %121 = arith.subf %104, %120 : vector<1x128xf32>
    %cst_21 = arith.constant 9.99999993E-9 : f32
    %122 = vector.broadcast %cst_21 : f32 to vector<1x128xf32>
    %123 = arith.mulf %122, %104 : vector<1x128xf32>
    %124 = arith.maximumf %121, %123 : vector<1x128xf32>
    %125 = math.log %124 : vector<1x128xf32>
    %126 = arith.subf %105, %125 : vector<1x128xf32>
    %127 = arith.mulf %19, %116 : vector<1x128xf32>
    %128 = arith.mulf %24, %126 : vector<1x128xf32>
    %129 = arith.addf %127, %128 : vector<1x128xf32>
    %130 = arith.addf %19, %24 : vector<1x128xf32>
    %131 = tpu.concatenate %129, %130 in 0 : vector<1x128xf32>, vector<1x128xf32> -> vector<2x128xf32>
    %c0_22 = arith.constant 0 : index
    %c0_23 = arith.constant 0 : index
    %c0_24 = arith.constant 0 : index
    %132 = vector.load %arg7[%c0_22, %c0_23, %c0_24] : memref<1x2x128xf32, #tpu.memory_space<vmem>>, vector<1x2x128xf32>
    %133 = vector.shape_cast %132 : vector<1x2x128xf32> to vector<2x128xf32>
    %134 = vector.shape_cast %131 : vector<2x128xf32> to vector<1x2x128xf32>
    tpu.vector_store %arg7[%c0_22, %c0_23, %c0_24], %134 {strides = array<i32>} : memref<1x2x128xf32, #tpu.memory_space<vmem>>, vector<1x2x128xf32>,
    return
  }
  func.func @transform_0(%arg0: i32) -> (i32, i32) {
    %c0_i32 = arith.constant 0 : i32
    %c0_i32_0 = arith.constant 0 : i32
    return %arg0, %c0_i32 : i32, i32
  }
  func.func @transform_1(%arg0: i32) -> (i32, i32) {
    %c0_i32 = arith.constant 0 : i32
    %c0_i32_0 = arith.constant 0 : i32
    %c0_i32_1 = arith.constant 0 : i32
    return %c0_i32, %c0_i32_0 : i32, i32
  }
  func.func @transform_2(%arg0: i32) -> (i32, i32) {
    %c0_i32 = arith.constant 0 : i32
    %c0_i32_0 = arith.constant 0 : i32
    %c0_i32_1 = arith.constant 0 : i32
    return %c0_i32, %c0_i32_0 : i32, i32
  }
  func.func @transform_3(%arg0: i32) -> (i32, i32) {
    %c0_i32 = arith.constant 0 : i32
    %c0_i32_0 = arith.constant 0 : i32
    %c0_i32_1 = arith.constant 0 : i32
    return %c0_i32, %c0_i32_0 : i32, i32
  }
  func.func @transform_4(%arg0: i32) -> (i32, i32) {
    %c0_i32 = arith.constant 0 : i32
    %c0_i32_0 = arith.constant 0 : i32
    return %c0_i32, %arg0 : i32, i32
  }
  func.func @transform_5(%arg0: i32) -> (i32, i32) {
    %c0_i32 = arith.constant 0 : i32
    %c0_i32_0 = arith.constant 0 : i32
    return %c0_i32, %arg0 : i32, i32
  }
  func.func @transform_6(%arg0: i32) -> (i32, i32, i32) {
    %c0_i32 = arith.constant 0 : i32
    %c0_i32_0 = arith.constant 0 : i32
    %c0_i32_1 = arith.constant 0 : i32
    return %arg0, %c0_i32, %c0_i32_0 : i32, i32, i32
  }
}

</mosaic_0001>

<bundles_post_ra>
// kernel: sub.1
= control target key start
LH: loop header
LB: loop body
LE: loop exit
PB: predicated region body
PF: predicated region fallthrough
CT: control target
= control target key end

     0   :  { %s34_s0 = inlined_call_operand.vmem [shape: f32[8], index: 0, kind: input, shape index: {}]   ;;  %s35_s1 = inlined_call_operand.vmem [shape: f32[8], index: 1, kind: input, shape index: {}]   ;;  %s36_s2 = inlined_call_operand.vmem [shape: f32[8], index: 2, kind: output, shape index: {}]  }
   0x1   :  { %v3_v0 = vld [vmem:[%s34_s0] sm:$0x1] }
   0x2   :  { %v4_v1 = vld [vmem:[%s35_s1] sm:$0x1] }
   0x3   :  { %v7_v2 = vsub.f32 %v3_v0, %v4_v1 }
   0x5   :  { %9 = vst [vmem:[%s36_s2] sm:$0x1] %v7_v2 }

// kernel: competing_risks_continuous_loss.1
= control target key start
LH: loop header
LB: loop body
LE: loop exit
PB: predicated region body
PF: predicated region fallthrough
CT: control target
= control target key end

     0   :  { %vm150_vm0 = vcmask 261120   ;;  %v489_v0 = vmov 0.0|0.0   ;;  %vm490_vm2 = vmmov 0   ;;  %v491_v4 = vmov 0.0   ;;  %s664_s0 = inlined_call_operand.vmem [shape: f32[128,32], index: 0, kind: input, shape index: {}]   ;;  %s665_s2 = inlined_call_operand.vmem [shape: f32[8,8], index: 2, kind: input, shape index: {}]   ;;  %s666_s3 = inlined_call_operand.vmem [shape: f32[8,3], index: 3, kind: input, shape index: {}]   ;;  %s667_s1 = inlined_call_operand.vmem [shape: f32[8,32], index: 1, kind: input, shape index: {}]   ;;  %s668_s5 = inlined_call_operand.vmem [shape: s32[1,128], index: 5, kind: input, shape index: {}]   ;;  %s669_s4 = inlined_call_operand.vmem [shape: f32[1,128], index: 4, kind: input, shape index: {}]   ;;  %s670_s6 = inlined_call_operand.vmem [shape: f32[1,2,128], index: 6, kind: output, shape index: {}]  }
   0x1   :  { %428 = vmatprep.subr.bf16.mxu0 %v489_v0  ;;  %v24_v1 = vld [vmem:[%s664_s0] sm:$0xff]  ;;  %v25_v2 = vld [vmem:[%s664_s0 + $0x8] sm:$0xff]  ;;  %vm544_vm1 = vmpackc.low %vm150_vm0, %vm150_vm0  ;;  %425 = vmatprep.mubr.msk.f32.mxu0 %vm490_vm2, %v491_v4  ;;  %v492_v6 = vmov 2   ;;  %v493_v7 = vmov 0   ;;  %v494_v12 = vmov 3   ;;  %v495_v15 = vmov 1  }
   0x2   :  { %v429_v5 = vpack.c.bf16 %v25_v2, %v24_v1  ;;  %473 = vset.pattern.permute.xlu1 %v492_v6  ;;  %471 = vset.pattern.permute.xlu0 %v493_v7  ;;  %v26_v8 = vld [vmem:[%s664_s0 + $0x10] sm:$0xff]  ;;  %v27_v9 = vld [vmem:[%s664_s0 + $0x18] sm:$0xff]  ;;  %v52_v10 = vld [vmem:[%s665_s2] sm:$0xff]  ;;  %v496_v17 = vmov 4   ;;  %v497_v18 = vmov 5   ;;  %v498_v21 = vmov 6  }
   0x3   :  { %v433_v11 = vpack.c.bf16 %v27_v9, %v26_v8  ;;  %86 = vperm.xlu1 %473, %v52_v10   ;;  %62 = vperm.xlu0 %471, %v52_v10   ;;  %v28_v13 = vld [vmem:[%s664_s0 + $0x20] sm:$0xff]  ;;  %v29_v14 = vld [vmem:[%s664_s0 + $0x28] sm:$0xff]  ;;  %v30_v19 = vld [vmem:[%s664_s0 + $0x30] sm:$0xff]  ;;  %v499_v24 = vmov 7   ;;  %v55_v40 = vlaneseq }
   0x4   :  { %431 = vmatpush3.bf16.xpose.msk.msra.mxu0 %vm544_vm1, %v429_v5  ;;  %v437_v16 = vpack.c.bf16 %v29_v14, %v28_v13  ;;  %v31_v20 = vld [vmem:[%s664_s0 + $0x38] sm:$0xff]  ;;  %v40_v22 = vld [vmem:[%s666_s3] sm:$0xff]  ;;  %v33_v26 = vld [vmem:[%s664_s0 + $0x48] sm:$0xff] }
   0x5   :  { %432 = vmatprep.subr.bf16.mxu0 %v489_v0  ;;  %v441_v23 = vpack.c.bf16 %v31_v20, %v30_v19  ;;  %v32_v25 = vld [vmem:[%s664_s0 + $0x40] sm:$0xff]  ;;  %v34_v28 = vld [vmem:[%s664_s0 + $0x50] sm:$0xff]  ;;  %v35_v29 = vld [vmem:[%s664_s0 + $0x58] sm:$0xff]  ;;  %v631_v42 = vshrl.u32 %v55_v40, 7 }
   0x6   :  { %v445_v27 = vpack.c.bf16 %v33_v26, %v32_v25  ;;  %v449_v30 = vpack.c.bf16 %v35_v29, %v34_v28  ;;  %v36_v31 = vld [vmem:[%s664_s0 + $0x60] sm:$0xff]  ;;  %v37_v32 = vld [vmem:[%s664_s0 + $0x68] sm:$0xff]  ;;  %v38_v34 = vld [vmem:[%s664_s0 + $0x70] sm:$0xff] }
   0x7   :  { %474 = vset.pattern.permute.xlu1 %v494_v12  ;;  %472 = vset.pattern.permute.xlu0 %v495_v15  ;;  %v453_v33 = vpack.c.bf16 %v37_v32, %v36_v31  ;;  %v39_v35 = vld [vmem:[%s664_s0 + $0x78] sm:$0xff]  ;;  %v23_v37 = vld [vmem:[%s667_s1] sm:$0xff]  ;;  %v634_v43 = vsub.s32 0, %v631_v42 }
   0x8   :  { %98 = vperm.xlu1 %474, %v52_v10   ;;  %74 = vperm.xlu0 %472, %v52_v10   ;;  %v457_v36 = vpack.c.bf16 %v39_v35, %v38_v34  ;;  %v628_v38 = vld [vmem:[%s668_s5] sm:$0x1] }
   0x9   :  { %v44_v39 = vshra.s32 %v628_v38, 8  ;;  %v43_v29 = vand.u32 255, %v628_v38 }
   0xb   :  { %v45_v41 = vand.u32 255, %v44_v39 }
   0xc   :  { %435 = vmatpush3.bf16.xpose.msk.msra.mxu0 %vm544_vm1, %v433_v11  ;;  %475 = vset.pattern.permute.xlu1 %v496_v17 }
   0xd   :  { %436 = vmatprep.subr.bf16.mxu0 %v489_v0  ;;  %110 = vperm.xlu1 %475, %v52_v10   ;;  %vm53_vm3 = vcmp.eq.s32.totalorder %v45_v41, 0  ;;  %vm66_vm4 = vcmp.eq.s32.totalorder %v45_v41, 1  ;;  %vm78_vm5 = vcmp.eq.s32.totalorder %v45_v41, 2  ;;  %vm90_vm6 = vcmp.eq.s32.totalorder %v45_v41, 3 }
   0xe   :  { %476 = vset.pattern.permute.xlu0 %v497_v18  ;;  %v54_v44 = vsel %vm53_vm3, 1, %v493_v7  ;;  %v67_v46 = vsel %vm66_vm4, 1, %v493_v7  ;;  %v79_v50 = vsel %vm78_vm5, 1, %v493_v7  ;;  %v91_v52 = vsel %vm90_vm6, 1, %v493_v7 }
   0xf   :  { %122 = vperm.xlu0 %476, %v52_v10   ;;  %v58_v45 = vrot.slane %v54_v44, %v634_v43  ;;  %v71_v49 = vrot.slane %v67_v46, %v634_v43  ;;  %v83_v51 = vrot.slane %v79_v50, %v634_v43  ;;  %vm102_vm8 = vcmp.eq.s32.totalorder %v45_v41, 4 }
  0x10   :  { %v95_v56 = vrot.slane %v91_v52, %v634_v43  ;;  %v103_v57 = vsel %vm102_vm8, 1, %v493_v7  ;;  %vm114_vm10 = vcmp.eq.s32.totalorder %v45_v41, 5  ;;  %vm126_vm12 = vcmp.eq.s32.totalorder %v45_v41, 6 }
  0x11   :  { %477 = vset.pattern.permute.xlu1 %v498_v21  ;;  %vm59_vm7 = vcmp.eq.s32.totalorder %v58_v45, 1  ;;  %vm72_vm9 = vcmp.eq.s32.totalorder %v71_v49, 1  ;;  %vm84_vm11 = vcmp.eq.s32.totalorder %v83_v51, 1  ;;  %v107_v59 = vrot.slane %v103_v57, %v634_v43 }
  0x12   :  { %134 = vperm.xlu1 %477, %v52_v10   ;;  %v115_v60 = vsel %vm114_vm10, 1, %v493_v7  ;;  %vm96_vm13 = vcmp.eq.s32.totalorder %v95_v56, 1  ;;  %vm138_vm14 = vcmp.eq.s32.totalorder %v45_v41, 7  ;;  %v49_v56 = vshra.s32 %v628_v38, 17 }
  0x13   :  { %479 = vset.pattern.permute.xlu0 %v493_v7  ;;  %v119_v63 = vrot.slane %v115_v60, %v634_v43  ;;  %vm108_vm15 = vcmp.eq.s32.totalorder %v107_v59, 1  ;;  %v139_v3 = vsel %vm138_vm14, 1, %v493_v7  ;;  %v46_v57 = vshra.s32 %v628_v38, 16 }
  0x14   :  { %439 = vmatpush3.bf16.xpose.msk.msra.mxu0 %vm544_vm1, %v437_v16  ;;  %274 = vperm.xlu0 %479, %v40_v22   ;;  %v143_v8 = vrot.slane %v139_v3, %v634_v43  ;;  %v50_v59 = vand.u32 1, %v49_v56  ;;  %vm351_vm4 = vcmask 1040384  }
  0x15   :  { %440 = vmatprep.subr.bf16.mxu0 %v489_v0 }
  0x16   :  { %478 = vset.pattern.permute.xlu1 %v499_v24  ;;  %vm144_vm2 = vcmp.eq.s32.totalorder %v143_v8, 1 }
  0x17   :  { %146 = vperm.xlu1 %478, %v52_v10   ;;  %v375_v10 = vld [vmem:[%s669_s4] ss:$0 sm:$0xff] }
  0x18   :  { %482 = vset.pattern.permute.xlu0 %v492_v6 }
  0x1b   :  { %480 = vset.pattern.permute.xlu1 %v495_v15 }
  0x1c   :  { %443 = vmatpush3.bf16.xpose.msk.msra.mxu0 %vm544_vm1, %v441_v23  ;;  %286 = vperm.xlu1 %480, %v40_v22  }
  0x1d   :  { %444 = vmatprep.subr.bf16.mxu0 %v489_v0 }
  0x20   :  { %481 = vset.pattern.permute.xlu1 %v492_v6 }
  0x21   :  { %325 = vperm.xlu1 %481, %v40_v22  }
  0x24   :  { %447 = vmatpush3.bf16.xpose.msk.msra.mxu0 %vm544_vm1, %v445_v27 }
  0x25   :  { %448 = vmatprep.subr.bf16.mxu0 %v489_v0 }
  0x2c   :  { %451 = vmatpush3.bf16.xpose.msk.msra.mxu0 %vm544_vm1, %v449_v30  ;;  %v312_v30 = vrot.slane %v43_v29, %v634_v43 }
  0x2d   :  { %452 = vmatprep.subr.bf16.mxu0 %v489_v0 }
  0x2e   :  { %vm313_vm3 = vcmp.eq.s32.totalorder %v631_v42, %v312_v30 }
  0x34   :  { %455 = vmatpush3.bf16.xpose.msk.msra.mxu0 %vm544_vm1, %v453_v33 }
  0x35   :  { %456 = vmatprep.subr.bf16.mxu0 %v489_v0  ;;  %v127_v0 = vsel %vm126_vm12, 1, %v493_v7 }
  0x36   :  { %v131_v2 = vrot.slane %v127_v0, %v634_v43 }
  0x3c   :  { %459 = vmatpush3.bf16.xpose.msk.msra.mxu0 %vm544_vm1, %v457_v36  ;;  %vm132_vm1 = vcmp.eq.s32.totalorder %v131_v2, 1 }
  0x43   :  { %426 = vmatmul.mubr.msk.f32.vlgmr.msra.gmra.mrb[0].mxu0 %vm150_vm0, %v23_v37  ;;  %vm120_vm0 = vcmp.eq.s32.totalorder %v119_v63, 1 }
  0x82   :  { %v87_v47 = vpop.permute.xlu1 %86  ;;  %v63_v48 = vpop.permute.xlu0 %62 }
  0x83   :  { %v65_v54 = vsel %vm59_vm7, %v63_v48, 0.0 }
  0x87   :  { %v99_v53 = vpop.permute.xlu1 %98  ;;  %v75_v55 = vpop.permute.xlu0 %74 }
  0x88   :  { %v77_v58 = vsel %vm72_vm9, %v75_v55, %v65_v54 }
  0x89   :  { %v89_v62 = vsel %vm84_vm11, %v87_v47, %v77_v58 }
  0x8a   :  { %v101_v1 = vsel %vm96_vm13, %v99_v53, %v89_v62 }
  0x8c   :  { %v111_v61 = vpop.permute.xlu1 %110 }
  0x8d   :  { %v113_v5 = vsel %vm108_vm15, %v111_v61, %v101_v1  ;;  %v47_v61 = vand.u32 1, %v46_v57  ;;  %v51_v1 = vcvt.s32.f32 %v50_v59 }
  0x8e   :  { %v123_v6 = vpop.permute.xlu0 %122 }
  0x8f   :  { %v125_v9 = vsel %vm120_vm0, %v123_v6, %v113_v5  ;;  %v48_v2 = vcvt.s32.f32 %v47_v61 }
  0x91   :  { %v135_v4 = vpop.permute.xlu1 %134  ;;  %v344_v6 = vadd.f32 %v51_v1, %v48_v2 }
  0x92   :  { %v137_v13 = vsel %vm132_vm1, %v135_v4, %v125_v9 }
  0x93   :  { %v275_v11 = vpop.permute.xlu0 %274 }
  0x94   :  { %v283_v14 = vmul.f32 %v375_v10, %v275_v11  ;;  %v349_v11 = vrot.slane %v344_v6, %v634_v43 }
  0x96   :  { %v147_v12 = vpop.permute.xlu1 %146 }
  0x97   :  { %v149_v15 = vsel %vm144_vm2, %v147_v12, %v137_v13 }
  0x9b   :  { %v287_v18 = vpop.permute.xlu1 %286 }
  0xa0   :  { %v326_v31 = vpop.permute.xlu1 %325 }
 0x116   :  { %v268_v16 = vpop.f32.mrb[0].mxu0 }
 0x117   :  { %v269_v7 = vadd.f32 %v268_v16, %v149_v15  ;;  %v427_v17 = vpop.f32.mrb[1].mxu0 }
 0x119   :  { %v284_v19 = vadd.f32 %v283_v14, %v269_v7 }
 0x11b   :  { %v289_v20 = vadd.f32 %v287_v18, %v284_v19 }
 0x11d   :  { %v290_v21 = vrot.slane %v289_v20, 4  ;;  %v314_v36 = vsel %vm313_vm3, %v289_v20, 0.0 }
 0x11e   :  { %v315_v41 = vrot.slane %v314_v36, 4 }
 0x11f   :  { %v291_v22 = vmax.f32 %v289_v20, %v290_v21 }
 0x120   :  { %v316_v48 = vadd.f32 %v315_v41, %v314_v36 }
 0x121   :  { %v292_v23 = vrot.slane %v291_v22, 2 }
 0x122   :  { %v317_v52 = vrot.slane %v316_v48, 2 }
 0x123   :  { %v293_v24 = vmax.f32 %v291_v22, %v292_v23 }
 0x124   :  { %v318_v55 = vadd.f32 %v317_v52, %v316_v48 }
 0x125   :  { %v294_v25 = vrot.slane %v293_v24, 1 }
 0x126   :  { %v319_v58 = vrot.slane %v318_v55, 1 }
 0x127   :  { %v295_v26 = vmax.f32 %v293_v24, %v294_v25 }
 0x128   :  { %v320_v63 = vadd.f32 %v319_v58, %v318_v55 }
 0x129   :  { %v296_v27 = vsub.f32 %v289_v20, %v295_v26 }
 0x12b   :  { %v297_v28 = vmul.f32 1.442695, %v296_v27 }
 0x12d   :  { %483 = vpow2.f32 %v297_v28 }
 0x137   :  { %v484_v32 = vpop.eup %483 }
 0x138   :  { %v299_v33 = vrot.slane %v484_v32, 4  ;;  %v328_v34 = vmul.f32 %v484_v32, %v326_v31 }
 0x13a   :  { %v300_v35 = vadd.f32 %v484_v32, %v299_v33  ;;  %v329_v37 = vrot.slane %v328_v34, 4 }
 0x13c   :  { %v301_v39 = vrot.slane %v300_v35, 2  ;;  %v330_v40 = vadd.f32 %v329_v37, %v328_v34 }
 0x13e   :  { %v302_v44 = vadd.f32 %v301_v39, %v300_v35  ;;  %v331_v45 = vrot.slane %v330_v40, 2 }
 0x140   :  { %v303_v46 = vrot.slane %v302_v44, 1  ;;  %v332_v47 = vadd.f32 %v331_v45, %v330_v40 }
 0x142   :  { %v304_v49 = vadd.f32 %v303_v46, %v302_v44  ;;  %v333_v50 = vrot.slane %v332_v47, 1 }
 0x144   :  { %485 = vlog2.f32 %v304_v49  ;;  %v334_v51 = vadd.f32 %v333_v50, %v332_v47  ;;  %v336_v42 = vmul.f32 1e-08, %v304_v49 }
 0x146   :  { %v335_v53 = vsub.f32 %v304_v49, %v334_v51 }
 0x148   :  { %v337_v54 = vmax.f32 %v335_v53, %v336_v42 }
 0x14a   :  { %487 = vlog2.f32 %v337_v54 }
 0x14e   :  { %v486_v60 = vpop.eup %485 }
 0x14f   :  { %v306_v62 = vmul.f32 0.6931472, %v486_v60 }
 0x151   :  { %v321_v0 = vadd.f32 %v306_v62, %v295_v26 }
 0x153   :  { %v322_v3 = vsub.f32 %v321_v0, %v320_v63 }
 0x154   :  { %v488_v4 = vpop.eup %487 }
 0x155   :  { %v323_v5 = vmin.f32 %v322_v3, 18.420681  ;;  %v339_v8 = vmul.f32 0.6931472, %v488_v4 }
 0x157   :  { %v340_v9 = vsub.f32 %v306_v62, %v339_v8  ;;  %v341_v10 = vmul.f32 %v323_v5, %v48_v2 }
 0x159   :  { %v342_v12 = vmul.f32 %v340_v9, %v51_v1 }
 0x15b   :  { %v343_v38 = vadd.f32 %v342_v12, %v341_v10 }
 0x15d   :  { %v352_v13 = vsel %vm351_vm4, %v343_v38, %v349_v11 }
 0x15e   :  { %353 = vst [vmem:[%s670_s6] sm:$0x3] %v352_v13 }

</bundles_post_ra>
